<compile_context>
chip_gen: v7x
topology: tpu7x:2x2x1
jax: 0.10.0
libtpu: 0.0.40
codegen_flags: <defaults>
</compile_context>

<pallas_src>
import functools

import jax
import jax.numpy as jnp
from jax.experimental import pallas as pl
from jax.experimental.pallas import tpu as pltpu


def _mlp_kernel(xt_ref, w1_ref, b1_ref, w2_ref, b2_ref, w3_ref, b3_ref, o_ref):
    # xt: (in, TILE_B); w*: PyTorch (out, in); b*: (out, 1); o: (Q_pad, TILE_B).
    # Layer 1: Linear + ReLU   (Dropout == identity in eval mode)
    h1 = jnp.dot(w1_ref[...], xt_ref[...], preferred_element_type=jnp.float32)
    h1 = jnp.maximum(h1 + b1_ref[...], 0.0)
    # Layer 2: Linear + ReLU   (Dropout == identity in eval mode)
    h2 = jnp.dot(w2_ref[...], h1.astype(w2_ref.dtype),
                 preferred_element_type=jnp.float32)
    h2 = jnp.maximum(h2 + b2_ref[...], 0.0)
    # Layer 3: Linear (per-quantile predictions), Q padded to 8 sublanes.
    out = jnp.dot(w3_ref[...], h2.astype(w3_ref.dtype),
                  preferred_element_type=jnp.float32)
    o_ref[...] = (out + b3_ref[...]).astype(o_ref.dtype)


def _choose_tile_b(batch, requested):
    """Multiple-of-128 batch tile; keeps >=2 grid steps when batch allows."""
    b128 = pl.cdiv(batch, 128) * 128
    t = max(128, (int(requested) // 128) * 128)
    t = min(t, b128)
    # Keep >=2 grid steps so the "parallel" axis can shard across v7x's 2 TCs.
    if b128 >= 256 and b128 // t < 2:
        t = max(128, ((b128 // 2) // 128) * 128)
    return t


@functools.partial(jax.jit, static_argnames=("compute_dtype", "tile_b"))
def quantreg_forward(x, params, *, compute_dtype=jnp.float32, tile_b=8192):
    """x: [batch, in_shape] float32; params: PyTorch-layout weights/biases.

    Returns [batch, num_quantiles] float32 (same as the nn.Module forward).
    """
    w1, b1 = params["w1"], params["b1"]
    w2, b2 = params["w2"], params["b2"]
    w3, b3 = params["w3"], params["b3"]
    B, in_shape = x.shape
    H = w1.shape[0]
    Q = w3.shape[0]
    Q_pad = pl.cdiv(Q, 8) * 8  # pad output rows to 8 sublanes -> unmasked vst

    tile = _choose_tile_b(B, tile_b)
    B_pad = pl.cdiv(B, tile) * tile
    grid = (B_pad // tile,)

    # Layout plumbing (all fused under jit): batch -> lane axis, pad, cast.
    xt = x.T.astype(compute_dtype)                          # (in, B)
    if B_pad != B:
        xt = jnp.pad(xt, ((0, 0), (0, B_pad - B)))          # (in, B_pad)
    w1c = w1.astype(compute_dtype)                          # (H, in)
    w2c = w2.astype(compute_dtype)                          # (H, H)
    w3c = jnp.zeros((Q_pad, H), compute_dtype).at[:Q].set(  # (Q_pad, H)
        w3.astype(compute_dtype))
    b1c = b1.reshape(H, 1).astype(jnp.float32)              # (H, 1)
    b2c = b2.reshape(H, 1).astype(jnp.float32)              # (H, 1)
    b3c = jnp.zeros((Q_pad, 1), jnp.float32).at[:Q, 0].set( # (Q_pad, 1)
        b3.astype(jnp.float32))

    full = lambda a: pl.BlockSpec(a.shape, lambda i: (0, 0))

    flops = 2 * B_pad * (in_shape * H + H * H + H * Q_pad)
    bytes_accessed = (
        xt.size * xt.dtype.itemsize
        + sum(a.size * a.dtype.itemsize for a in (w1c, w2c, w3c, b1c, b2c, b3c))
        + Q_pad * B_pad * 4
    )

    out_t = pl.pallas_call(
        _mlp_kernel,
        out_shape=jax.ShapeDtypeStruct((Q_pad, B_pad), jnp.float32),
        grid=grid,
        in_specs=[
            pl.BlockSpec((in_shape, tile), lambda i: (0, i)),   # xT tile
            full(w1c), full(b1c),
            full(w2c), full(b2c),
            full(w3c), full(b3c),
        ],
        out_specs=pl.BlockSpec((Q_pad, tile), lambda i: (0, i)),
        compiler_params=pltpu.CompilerParams(
            dimension_semantics=("parallel",),
            vmem_limit_bytes=32 * 1024 * 1024,
        ),
        cost_estimate=pl.CostEstimate(
            flops=flops, transcendentals=0, bytes_accessed=bytes_accessed),
    )(xt, w1c, b1c, w2c, b2c, w3c, b3c)

    # Back to PyTorch [batch, num_quantiles]; slice/transpose fuse under jit.
    return out_t[:Q, :B].T


def orthogonal_init(key, rows, cols, dtype=jnp.float32):
    """Deterministic orthogonal init (same spirit as nn.init.orthogonal_)."""
    if rows >= cols:
        a = jax.random.normal(key, (rows, cols), dtype)
        q, r = jnp.linalg.qr(a)
    else:
        a = jax.random.normal(key, (cols, rows), dtype)
        q, r = jnp.linalg.qr(a)
        q = q.T
    d = jnp.sign(jnp.diagonal(r))
    q = q * d[None, :] if rows >= cols else q * d[:, None]
    return q.astype(dtype)


def make_params(key, in_shape, hidden_size, num_quantiles):
    """PyTorch-layout parameters: W is (out_features, in_features), b is (out,)."""
    k1, k2, k3 = jax.random.split(key, 3)
    return {
        "w1": orthogonal_init(k1, hidden_size, in_shape),       # (H, in)
        "b1": jnp.zeros((hidden_size,), jnp.float32),
        "w2": orthogonal_init(k2, hidden_size, hidden_size),    # (H, H)
        "b2": jnp.zeros((hidden_size,), jnp.float32),
        "w3": orthogonal_init(k3, num_quantiles, hidden_size),  # (Q, H)
        "b3": jnp.zeros((num_quantiles,), jnp.float32),
    }


def reference_forward(x, p):
    h1 = jnp.maximum(x @ p["w1"].T + p["b1"], 0.0)
    h2 = jnp.maximum(h1 @ p["w2"].T + p["b2"], 0.0)
    return h2 @ p["w3"].T + p["b3"]


if __name__ == "__main__":
    # Shapes consistent with the module: quantiles=[0.05, 0.95],
    # in_shape=4, hidden_size=32.
    quantiles = [0.05, 0.95]
    in_shape, hidden_size, num_quantiles = 4, 32, len(quantiles)

    key = jax.random.PRNGKey(0)
    kx, kp, kx2 = jax.random.split(key, 3)
    params = make_params(kp, in_shape, hidden_size, num_quantiles)

    # Small batch: single grid step, batch padded to 128 lanes.
    x = jax.random.normal(kx, (8, in_shape), jnp.float32)
    ref = reference_forward(x, params)
    out_f32 = jax.block_until_ready(quantreg_forward(x, params))
    assert out_f32.shape == (8, num_quantiles)
    assert jnp.allclose(out_f32, ref, atol=1e-5, rtol=1e-5), "f32 mismatch vs reference"

    # bf16-MXU / f32-accumulate path still available.
    out_bf16 = jax.block_until_ready(
        quantreg_forward(x, params, compute_dtype=jnp.bfloat16))
    assert jnp.allclose(out_bf16, ref, atol=5e-2, rtol=5e-2), "bf16 mismatch vs reference"

    # Batch that is not a multiple of 128: exercises padding + multi-step grid
    # (tile clamp keeps >=2 steps so the parallel axis can use both v7x TCs).
    x2 = jax.random.normal(kx2, (300, in_shape), jnp.float32)
    ref2 = reference_forward(x2, params)
    out2 = jax.block_until_ready(quantreg_forward(x2, params))
    assert out2.shape == (300, num_quantiles)
    assert jnp.allclose(out2, ref2, atol=1e-5, rtol=1e-5), "multi-tile mismatch vs reference"

    print("KERNEL_OK")
</pallas_src>

<mosaic_0001>
module attributes {stable_mosaic.version = 11 : i64} {
  func.func @_mlp_kernel(%arg0: i32, %arg1: memref<4x128xf32, #tpu.memory_space<vmem>>, %arg2: memref<32x4xf32, #tpu.memory_space<vmem>>, %arg3: memref<32x1xf32, #tpu.memory_space<vmem>>, %arg4: memref<32x32xf32, #tpu.memory_space<vmem>>, %arg5: memref<32x1xf32, #tpu.memory_space<vmem>>, %arg6: memref<8x32xf32, #tpu.memory_space<vmem>>, %arg7: memref<8x1xf32, #tpu.memory_space<vmem>>, %arg8: memref<8x128xf32, #tpu.memory_space<vmem>>) attributes {dimension_semantics = [#tpu.dimension_semantics<parallel>], iteration_bounds = array<i64: 1>, scalar_prefetch = 0 : i64, scratch_operands = 0 : i64, tpu.core_type = #tpu.core_type<tc>, window_params = [{transform_indices = @transform_0, window_bounds = array<i64: 4, 128>}, {pipeline_mode = #tpu.pipeline_mode<synchronous>, transform_indices = @transform_1, window_bounds = array<i64: 32, 4>}, {pipeline_mode = #tpu.pipeline_mode<synchronous>, transform_indices = @transform_2, window_bounds = array<i64: 32, 1>}, {pipeline_mode = #tpu.pipeline_mode<synchronous>, transform_indices = @transform_3, window_bounds = array<i64: 32, 32>}, {pipeline_mode = #tpu.pipeline_mode<synchronous>, transform_indices = @transform_4, window_bounds = array<i64: 32, 1>}, {pipeline_mode = #tpu.pipeline_mode<synchronous>, transform_indices = @transform_5, window_bounds = array<i64: 8, 32>}, {pipeline_mode = #tpu.pipeline_mode<synchronous>, transform_indices = @transform_6, window_bounds = array<i64: 8, 1>}, {transform_indices = @transform_7, window_bounds = array<i64: 8, 128>}]} {
    %c0 = arith.constant 0 : index
    %c0_0 = arith.constant 0 : index
    %0 = vector.load %arg2[%c0, %c0_0] : memref<32x4xf32, #tpu.memory_space<vmem>>, vector<32x4xf32>
    %c0_1 = arith.constant 0 : index
    %c0_2 = arith.constant 0 : index
    %1 = vector.load %arg1[%c0_1, %c0_2] : memref<4x128xf32, #tpu.memory_space<vmem>>, vector<4x128xf32>
    %cst = arith.constant dense<0.000000e+00> : vector<32x128xf32>
    %2 = tpu.matmul %0, %1, %cst {dimension_numbers = #tpu.dot_dimension_numbers<[1], [0], [0], [1], [0, 0, 1, 1], [], []>} : vector<32x4xf32>, vector<4x128xf32>, vector<32x128xf32> -> vector<32x128xf32>
    %c0_3 = arith.constant 0 : index
    %c0_4 = arith.constant 0 : index
    %3 = vector.load %arg3[%c0_3, %c0_4] : memref<32x1xf32, #tpu.memory_space<vmem>>, vector<32x1xf32>
    %4 = vector.broadcast %3 : vector<32x1xf32> to vector<32x128xf32>
    %5 = arith.addf %2, %4 : vector<32x128xf32>
    %cst_5 = arith.constant 0.000000e+00 : f32
    %6 = vector.broadcast %cst_5 : f32 to vector<32x128xf32>
    %7 = arith.maximumf %5, %6 : vector<32x128xf32>
    %c0_6 = arith.constant 0 : index
    %c0_7 = arith.constant 0 : index
    %8 = vector.load %arg4[%c0_6, %c0_7] : memref<32x32xf32, #tpu.memory_space<vmem>>, vector<32x32xf32>
    %cst_8 = arith.constant dense<0.000000e+00> : vector<32x128xf32>
    %9 = tpu.matmul %8, %7, %cst_8 {dimension_numbers = #tpu.dot_dimension_numbers<[1], [0], [0], [1], [0, 0, 1, 1], [], []>} : vector<32x32xf32>, vector<32x128xf32>, vector<32x128xf32> -> vector<32x128xf32>
    %c0_9 = arith.constant 0 : index
    %c0_10 = arith.constant 0 : index
    %10 = vector.load %arg5[%c0_9, %c0_10] : memref<32x1xf32, #tpu.memory_space<vmem>>, vector<32x1xf32>
    %11 = vector.broadcast %10 : vector<32x1xf32> to vector<32x128xf32>
    %12 = arith.addf %9, %11 : vector<32x128xf32>
    %cst_11 = arith.constant 0.000000e+00 : f32
    %13 = vector.broadcast %cst_11 : f32 to vector<32x128xf32>
    %14 = arith.maximumf %12, %13 : vector<32x128xf32>
    %c0_12 = arith.constant 0 : index
    %c0_13 = arith.constant 0 : index
    %15 = vector.load %arg6[%c0_12, %c0_13] : memref<8x32xf32, #tpu.memory_space<vmem>>, vector<8x32xf32>
    %cst_14 = arith.constant dense<0.000000e+00> : vector<8x128xf32>
    %16 = tpu.matmul %15, %14, %cst_14 {dimension_numbers = #tpu.dot_dimension_numbers<[1], [0], [0], [1], [0, 0, 1, 1], [], []>} : vector<8x32xf32>, vector<32x128xf32>, vector<8x128xf32> -> vector<8x128xf32>
    %c0_15 = arith.constant 0 : index
    %c0_16 = arith.constant 0 : index
    %17 = vector.load %arg7[%c0_15, %c0_16] : memref<8x1xf32, #tpu.memory_space<vmem>>, vector<8x1xf32>
    %18 = vector.broadcast %17 : vector<8x1xf32> to vector<8x128xf32>
    %19 = arith.addf %16, %18 : vector<8x128xf32>
    %c0_17 = arith.constant 0 : index
    %c0_18 = arith.constant 0 : index
    %20 = vector.load %arg8[%c0_17, %c0_18] : memref<8x128xf32, #tpu.memory_space<vmem>>, vector<8x128xf32>
    tpu.vector_store %arg8[%c0_17, %c0_18], %19 {strides = array<i32>} : memref<8x128xf32, #tpu.memory_space<vmem>>, vector<8x128xf32>,
    return
  }
  func.func @transform_0(%arg0: i32) -> (i32, i32) {
    %c0_i32 = arith.constant 0 : i32
    %c0_i32_0 = arith.constant 0 : i32
    return %c0_i32, %arg0 : i32, i32
  }
  func.func @transform_1(%arg0: i32) -> (i32, i32) {
    %c0_i32 = arith.constant 0 : i32
    %c0_i32_0 = arith.constant 0 : i32
    %c0_i32_1 = arith.constant 0 : i32
    return %c0_i32, %c0_i32_0 : i32, i32
  }
  func.func @transform_2(%arg0: i32) -> (i32, i32) {
    %c0_i32 = arith.constant 0 : i32
    %c0_i32_0 = arith.constant 0 : i32
    %c0_i32_1 = arith.constant 0 : i32
    return %c0_i32, %c0_i32_0 : i32, i32
  }
  func.func @transform_3(%arg0: i32) -> (i32, i32) {
    %c0_i32 = arith.constant 0 : i32
    %c0_i32_0 = arith.constant 0 : i32
    %c0_i32_1 = arith.constant 0 : i32
    return %c0_i32, %c0_i32_0 : i32, i32
  }
  func.func @transform_4(%arg0: i32) -> (i32, i32) {
    %c0_i32 = arith.constant 0 : i32
    %c0_i32_0 = arith.constant 0 : i32
    %c0_i32_1 = arith.constant 0 : i32
    return %c0_i32, %c0_i32_0 : i32, i32
  }
  func.func @transform_5(%arg0: i32) -> (i32, i32) {
    %c0_i32 = arith.constant 0 : i32
    %c0_i32_0 = arith.constant 0 : i32
    %c0_i32_1 = arith.constant 0 : i32
    return %c0_i32, %c0_i32_0 : i32, i32
  }
  func.func @transform_6(%arg0: i32) -> (i32, i32) {
    %c0_i32 = arith.constant 0 : i32
    %c0_i32_0 = arith.constant 0 : i32
    %c0_i32_1 = arith.constant 0 : i32
    return %c0_i32, %c0_i32_0 : i32, i32
  }
  func.func @transform_7(%arg0: i32) -> (i32, i32) {
    %c0_i32 = arith.constant 0 : i32
    %c0_i32_0 = arith.constant 0 : i32
    return %c0_i32, %arg0 : i32, i32
  }
}

</mosaic_0001>

<bundles_post_ra>
// kernel: quantreg_forward.1
= control target key start
LH: loop header
LB: loop body
LE: loop exit
PB: predicated region body
PF: predicated region fallthrough
CT: control target
= control target key end

     0   :  { %vm68_vm0 = vcmask 1043456   ;;  %vm55_vm1 = vcmask 31744   ;;  %v457_v3 = vmov 0   ;;  %vm189_vm2 = vcmask 261120   ;;  %s570_s0 = inlined_call_operand.vmem [shape: f32[4,128], index: 0, kind: input, shape index: {}]   ;;  %s571_s1 = inlined_call_operand.vmem [shape: f32[32,4], index: 1, kind: input, shape index: {}]   ;;  %s572_s2 = inlined_call_operand.vmem [shape: f32[32,1], index: 2, kind: input, shape index: {}]   ;;  %s573_s4 = inlined_call_operand.vmem [shape: f32[32,1], index: 4, kind: input, shape index: {}]   ;;  %s574_s6 = inlined_call_operand.vmem [shape: f32[8,1], index: 6, kind: input, shape index: {}]   ;;  %s575_s3 = inlined_call_operand.vmem [shape: f32[32,32], index: 3, kind: input, shape index: {}]   ;;  %s576_s5 = inlined_call_operand.vmem [shape: f32[8,32], index: 5, kind: input, shape index: {}]   ;;  %s577_s7 = inlined_call_operand.vmem [shape: f32[8,128], index: 7, kind: output, shape index: {}]  }
   0x1   :  { %v30_v0 = vld [vmem:[%s570_s0] sm:$0xf]  ;;  %v27_v2 = vld [vmem:[%s571_s1 + $0x8] sm:$0xff]  ;;  %455 = vset.pattern.permute.xlu0 %v457_v3  ;;  %456 = vset.pattern.permute.xlu1 %v457_v3  ;;  %v28_v4 = vld [vmem:[%s571_s1 + $0x10] sm:$0xff]  ;;  %v458_v37 = vmov 0.0|0.0   ;;  %vm459_vm3 = vmmov 0  }
   0x2   :  { %v26_v1 = vld [vmem:[%s571_s1] sm:$0xff]  ;;  %404 = vmatprep.subr.msk.mxu0 %vm68_vm0, %v30_v0  ;;  %v33_v6 = vld [vmem:[%s572_s2 + $0x10] sm:$0xff]  ;;  %v32_v7 = vld [vmem:[%s572_s2 + $0x8] sm:$0xff]  ;;  %v460_v38 = vmov 0.0  }
   0x3   :  { %406 = vmatprep.mubr.msk.f32.mxu0 %vm55_vm1, %v26_v1  ;;  %v31_v5 = vld [vmem:[%s572_s2] sm:$0xff]  ;;  %405 = vmatpush3.msk.msra.mxu0 %vm68_vm0, %v30_v0  ;;  %v29_v8 = vld [vmem:[%s571_s1 + $0x18] sm:$0xff]  ;;  %v166_v11 = vld [vmem:[%s573_s4 + $0x8] sm:$0xff] }
   0x4   :  { %37 = vperm.xlu0 %455, %v31_v5   ;;  %407 = vmatmul.mubr.msk.f32.vlgmr.msra.gmra.mrb[0].mxu0 %vm55_vm1, %v27_v2  ;;  %v34_v9 = vld [vmem:[%s572_s2 + $0x18] sm:$0xff]  ;;  %v165_v10 = vld [vmem:[%s573_s4] sm:$0xff]  ;;  %v167_v12 = vld [vmem:[%s573_s4 + $0x10] sm:$0xff] }
   0x5   :  { %47 = vperm.xlu1 %456, %v33_v6   ;;  %409 = vmatprep.mubr.msk.f32.mxu0 %vm55_vm1, %v28_v4  ;;  %v168_v13 = vld [vmem:[%s573_s4 + $0x18] sm:$0xff]  ;;  %v292_v14 = vld [vmem:[%s574_s6] sm:$0xff]  ;;  %v162_v34 = vld [vmem:[%s575_s3 + $0x8] sm:$0xff] }
   0x6   :  { %v161_v15 = vld [vmem:[%s575_s3] sm:$0xff]  ;;  %v163_v35 = vld [vmem:[%s575_s3 + $0x10] sm:$0xff]  ;;  %v164_v36 = vld [vmem:[%s575_s3 + $0x18] sm:$0xff]  ;;  %445 = vmatprep.subr.bf16.mxu0 %v458_v37 }
   0x7   :  { %420 = vmatprep.mubr.msk.f32.mxu1 %vm189_vm2, %v161_v15  ;;  %v291_v57 = vld [vmem:[%s576_s5] sm:$0xff] }
   0x8   :  { %42 = vperm.xlu0 %455, %v32_v7   ;;  %410 = vmatmul.mubr.msk.f32.gmra.mrb[2].mxu0 %vm55_vm1, %v29_v8 }
   0x9   :  { %52 = vperm.xlu1 %456, %v34_v9   ;;  %434 = vmatprep.mubr.msk.f32.mxu0 %vm459_vm3, %v460_v38 }
   0xc   :  { %171 = vperm.xlu0 %455, %v165_v10  }
   0xd   :  { %176 = vperm.xlu1 %456, %v166_v11  }
  0x10   :  { %181 = vperm.xlu0 %455, %v167_v12  }
  0x11   :  { %186 = vperm.xlu1 %456, %v168_v13  }
  0x14   :  { %295 = vperm.xlu0 %455, %v292_v14  }
  0x83   :  { %v38_v16 = vpop.permute.xlu0 %37 }
  0x84   :  { %v48_v17 = vpop.permute.xlu1 %47 }
  0x87   :  { %v43_v18 = vpop.permute.xlu0 %42 }
  0x88   :  { %v53_v24 = vpop.permute.xlu1 %52 }
  0x8b   :  { %v172_v40 = vpop.permute.xlu0 %171 }
  0x8c   :  { %v177_v39 = vpop.permute.xlu1 %176 }
  0x8f   :  { %v182_v49 = vpop.permute.xlu0 %181 }
  0x90   :  { %v187_v46 = vpop.permute.xlu1 %186 }
  0x93   :  { %v296_v58 = vpop.permute.xlu0 %295 }
  0xd7   :  { %v408_v19 = vpop.f32.mrb[0].mxu0 }
  0xd8   :  { %v144_v20 = vadd.f32 %v408_v19, %v43_v18  ;;  %v138_v21 = vpop.f32.mrb[1].mxu0 }
  0xd9   :  { %v139_v22 = vadd.f32 %v138_v21, %v38_v16 }
  0xda   :  { %v158_v23 = vmax.f32 %v144_v20, 0.0 }
  0xdb   :  { %v157_v25 = vmax.f32 %v139_v22, 0.0  ;;  %v411_v26 = vpop.f32.mrb[2].mxu0 }
  0xdc   :  { %v154_v27 = vadd.f32 %v411_v26, %v53_v24  ;;  %v148_v28 = vpop.f32.mrb[3].mxu0 }
  0xdd   :  { %v149_v29 = vadd.f32 %v148_v28, %v48_v17  ;;  %v437_v30 = vpack.c.bf16 %v158_v23, %v157_v25 }
  0xde   :  { %v160_v31 = vmax.f32 %v154_v27, 0.0 }
  0xdf   :  { %v159_v32 = vmax.f32 %v149_v29, 0.0  ;;  %438 = vmatprep.subr.bf16.mxu1 %v437_v30 }
  0xe0   :  { %440 = vmatpush3.bf16.msra.mxu1 %v437_v30 }
  0xe1   :  { %v441_v33 = vpack.c.bf16 %v160_v31, %v159_v32 }
  0xe3   :  { %442 = vmatprep.subr.bf16.mxu1 %v441_v33 }
  0xe4   :  { %444 = vmatpush3.bf16.msra.mxu1 %v441_v33 }
  0xe7   :  { %421 = vmatmul.mubr.msk.f32.vlgmr.msra.gmra.mrb[0].mxu1 %vm189_vm2, %v162_v34 }
  0xe8   :  { %423 = vmatprep.mubr.msk.f32.mxu1 %vm189_vm2, %v163_v35 }
  0xeb   :  { %424 = vmatmul.mubr.msk.f32.gmra.mrb[2].mxu1 %vm189_vm2, %v164_v36 }
 0x1ba   :  { %v422_v41 = vpop.f32.mrb[0].mxu1 }
 0x1bb   :  { %v274_v42 = vadd.f32 %v422_v41, %v177_v39  ;;  %v268_v43 = vpop.f32.mrb[1].mxu1 }
 0x1bc   :  { %v269_v44 = vadd.f32 %v268_v43, %v172_v40 }
 0x1bd   :  { %v288_v45 = vmax.f32 %v274_v42, 0.0 }
 0x1be   :  { %v287_v47 = vmax.f32 %v269_v44, 0.0  ;;  %v425_v48 = vpop.f32.mrb[2].mxu1 }
 0x1bf   :  { %v284_v50 = vadd.f32 %v425_v48, %v187_v46  ;;  %v278_v51 = vpop.f32.mrb[3].mxu1 }
 0x1c0   :  { %v446_v52 = vpack.c.bf16 %v288_v45, %v287_v47  ;;  %v279_v53 = vadd.f32 %v278_v51, %v182_v49 }
 0x1c1   :  { %v290_v54 = vmax.f32 %v284_v50, 0.0 }
 0x1c2   :  { %v289_v55 = vmax.f32 %v279_v53, 0.0  ;;  %447 = vmatpush3.bf16.msra.mxu0 %v446_v52 }
 0x1c3   :  { %448 = vmatprep.subr.bf16.mxu0 %v458_v37 }
 0x1c4   :  { %v449_v56 = vpack.c.bf16 %v290_v54, %v289_v55 }
 0x1c6   :  { %450 = vmatpush3.bf16.msra.mxu0 %v449_v56 }
 0x1c9   :  { %435 = vmatmul.mubr.msk.f32.vlgmr.msra.gmra.mrb[4].mxu0 %vm189_vm2, %v291_v57 }
 0x29c   :  { %v367_v59 = vpop.f32.mrb[4].mxu0 }
 0x29d   :  { %v368_v60 = vadd.f32 %v367_v59, %v296_v58  ;;  %v436_v61 = vpop.f32.mrb[5].mxu0 }
 0x29f   :  { %371 = vst [vmem:[%s577_s7] sm:$0xff] %v368_v60 }

</bundles_post_ra>
